<compile_context>
chip_gen: v7x
topology: tpu7x:2x2x1
jax: 0.10.0
libtpu: 0.0.40
codegen_flags: <defaults>
</compile_context>

<pallas_src>
import functools
import itertools

import numpy as np
import jax
import jax.numpy as jnp
from jax.experimental import pallas as pl
from jax.experimental.pallas import tpu as pltpu

ALPHA = 0.25
GAMMA = 2.0  # used as p*p since gamma == 2.0


def _round_up(x, m):
    return ((x + m - 1) // m) * m


# ----------------------------- Pallas kernel -------------------------------

def _cost_kernel(pred_ref, tbox_ref, out_ref, *, w_class, w_bbox, w_giou):
    # pred_ref: (1, 5, TN)  rows 0..3 = cx,cy,w,h ; row 4 = class-0 logit
    # tbox_ref: (1, T_pad, 4)
    # out_ref : (1, T_pad, TN)

    # ---- focal class cost (O(TN), constant over targets) + GIoU "+1" fold ----
    x = pred_ref[0, 4:5, :]                                   # (1, TN)
    p = jax.nn.sigmoid(x)
    neg = (1.0 - ALPHA) * (p * p) * (-jnp.log(1.0 - p + 1e-8))
    pos = ALPHA * ((1.0 - p) * (1.0 - p)) * (-jnp.log(p + 1e-8))
    bias = w_class * (pos - neg) + w_giou                     # (1, TN)

    # ---- predicted boxes: each coordinate is a lane-dense row ----
    pcx = pred_ref[0, 0:1, :]                                 # (1, TN)
    pcy = pred_ref[0, 1:2, :]
    pw = pred_ref[0, 2:3, :]
    ph = pred_ref[0, 3:4, :]

    # ---- target boxes: each coordinate is a sublane column ----
    tb = tbox_ref[0]                                          # (T_pad, 4)
    tcx = tb[:, 0:1]                                          # (T_pad, 1)
    tcy = tb[:, 1:2]
    tw = tb[:, 2:3]
    th = tb[:, 3:4]

    # pairwise L1 (torch.cdist p=1); w_bbox pre-folded into the small operands
    # (valid because |w*a - w*b| == w*|a - b| for w >= 0).
    if w_bbox >= 0.0:
        s = w_bbox
        cost_bbox = (jnp.abs(s * pcx - s * tcx) + jnp.abs(s * pcy - s * tcy)
                     + jnp.abs(s * pw - s * tw) + jnp.abs(s * ph - s * th))
    else:  # static fallback (negative weight): per-element multiply
        cost_bbox = w_bbox * (jnp.abs(pcx - tcx) + jnp.abs(pcy - tcy)
                              + jnp.abs(pw - tw) + jnp.abs(ph - th))

    # cxcywh -> xyxy (half-width temps on the small vectors only)
    phw, phh = 0.5 * pw, 0.5 * ph
    thw, thh = 0.5 * tw, 0.5 * th
    px0, px1 = pcx - phw, pcx + phw
    py0, py1 = pcy - phh, pcy + phh
    tx0, tx1 = tcx - thw, tcx + thw
    ty0, ty1 = tcy - thh, tcy + thh

    area_p = pw * ph                                          # (1, TN)
    area_t = tw * th                                          # (T_pad, 1)

    iw = jnp.maximum(jnp.minimum(px1, tx1) - jnp.maximum(px0, tx0), 0.0)
    ih = jnp.maximum(jnp.minimum(py1, ty1) - jnp.maximum(py0, ty0), 0.0)
    inter = iw * ih                                           # (T_pad, TN)
    union = jnp.maximum(area_p + area_t - inter, 1e-12)       # clamp: degenerate boxes
    # enclosing box: widths/heights are >= 0 by construction (no clamp needed)
    cw = jnp.maximum(px1, tx1) - jnp.minimum(px0, tx0)
    ch = jnp.maximum(py1, ty1) - jnp.minimum(py0, ty0)
    area_c = jnp.maximum(cw * ch, 1e-12)                      # clamp: degenerate boxes

    # divides -> EUP approx reciprocals (the VALU slot is the binding resource)
    inv_u = pl.reciprocal(union, approx=True)
    inv_c = pl.reciprocal(area_c, approx=True)
    # giou = iou - (area_c - union)/area_c  =>  w_giou*(-giou) = w_giou - w_giou*(iou + union/area_c)
    giou_sum = inter * inv_u + union * inv_c                  # iou + union/area_c

    # cost_embed == 0 (text_embeddings=None path of the reference module)
    out_ref[0] = cost_bbox + bias - w_giou * giou_sum


def _choose_tn(n_pad, t_pad, p, out_budget_bytes=6 << 20):
    """Largest 128-multiple divisor of n_pad whose (T_pad, tn) f32 output block fits
    the per-buffer VMEM budget; keeps >= 2 total grid steps when possible (v7x)."""
    k = n_pad // 128
    cands = sorted({128 * d for d in range(1, k + 1) if k % d == 0}, reverse=True)
    fit = [t for t in cands if t * t_pad * 4 <= out_budget_bytes] or [cands[-1]]
    tn = fit[0]
    if p * (n_pad // tn) < 2:                     # keep both v7x TensorCores busy
        for t in fit:
            if p * (n_pad // t) >= 2:
                tn = t
                break
    return tn


def compute_patch_cost_matrices(pred_p, tbox_p, *, cost_class=1.0, cost_bbox=1.0,
                                cost_giou=1.0, tn=None):
    """pred_p: (P,5,N_pad) [cx,cy,w,h,logit0]; tbox_p: (P,T_pad,4) -> (P,T_pad,N_pad)."""
    P, five, N_pad = pred_p.shape
    assert five == 5 and N_pad % 128 == 0
    T_pad = tbox_p.shape[1]
    if tn is None:
        tn = _choose_tn(N_pad, T_pad, P)
    assert N_pad % tn == 0 and tn % 128 == 0

    # VMEM: double-buffered output + double-buffered inputs + headroom.
    # Budgeted so the total stays safe on v5e (16 MiB scoped default) and v7x (64 MiB).
    out_block = T_pad * tn * 4
    in_block = 5 * tn * 4 + T_pad * 4 * 4
    vmem_limit = int(min(max(2 * (out_block + in_block) + (4 << 20), 16 << 20), 48 << 20))

    # TODO(synk): for very large T_pad, tile the target (sublane) axis with an extra
    # "arbitrary" grid axis instead of shrinking tn, to keep lane-dense stores.
    kern = functools.partial(_cost_kernel, w_class=float(cost_class),
                             w_bbox=float(cost_bbox), w_giou=float(cost_giou))
    return pl.pallas_call(
        kern,
        out_shape=jax.ShapeDtypeStruct((P, T_pad, N_pad), jnp.float32),
        grid=(P, N_pad // tn),
        in_specs=[
            pl.BlockSpec((1, 5, tn), lambda p, n: (p, 0, n)),
            pl.BlockSpec((1, T_pad, 4), lambda p, n: (p, 0, 0)),
        ],
        out_specs=pl.BlockSpec((1, T_pad, tn), lambda p, n: (p, 0, n)),
        compiler_params=pltpu.CompilerParams(
            dimension_semantics=("parallel", "parallel"),
            vmem_limit_bytes=vmem_limit),
    )(pred_p, tbox_p)


# ----------------------- host-side Hungarian (small sizes) ------------------

def _linear_sum_assignment(c):
    """Exact min-cost assignment via brute force (tiny matrices only)."""
    # TODO(synk): scipy.optimize.linear_sum_assignment has no Pallas equivalent; the
    # combinatorial assignment is solved host-side on tiny per-batch cost blocks.
    c = np.asarray(c, np.float64)
    nr, nc = c.shape
    if nr == 0 or nc == 0:
        return np.array([], np.int64), np.array([], np.int64)
    if nr <= nc:
        best_cost, best_cols = None, None
        for cols in itertools.permutations(range(nc), nr):
            s = float(c[np.arange(nr), list(cols)].sum())
            if best_cost is None or s < best_cost:
                best_cost, best_cols = s, cols
        return np.arange(nr, dtype=np.int64), np.array(best_cols, np.int64)
    r_t, c_t = _linear_sum_assignment(c.T)
    rows, cols = c_t, r_t
    order = np.argsort(rows, kind="stable")
    return rows[order].astype(np.int64), cols[order].astype(np.int64)


# ------------------------------- matcher ------------------------------------

class OVHungarianMatcherPallas:
    def __init__(self, cost_class=1.0, cost_bbox=1.0, cost_giou=1.0, cost_embed=0.5):
        assert cost_class != 0 or cost_bbox != 0 or cost_giou != 0 or cost_embed != 0
        self.cost_class = cost_class
        self.cost_bbox = cost_bbox
        self.cost_giou = cost_giou
        self.cost_embed = cost_embed

    def __call__(self, outputs, targets, select_id, text_embeddings=None):
        # TODO(synk): text_embeddings / pred_embed cosine cost path is not implemented;
        # None-embedding path (cost_embed contribution = 0) is used, matching the
        # reference's `else` branch.
        pred_logits = np.asarray(outputs["pred_logits"], np.float32)  # (bs, P*Q, C)
        pred_boxes = np.asarray(outputs["pred_boxes"], np.float32)    # (bs, P*Q, 4)
        bs, total_q, C = pred_logits.shape
        P = len(select_id)
        Q = total_q // P
        N = bs * Q

        # class column 0 only; queries batch-major on the lane axis
        logit0 = pred_logits.reshape(bs, P, Q, C)[..., 0]             # (bs, P, Q)
        logit0 = np.transpose(logit0, (1, 0, 2)).reshape(P, N)        # (P, N)
        boxes4 = pred_boxes.reshape(bs, P, Q, 4)
        boxes_t = np.transpose(boxes4, (1, 3, 0, 2)).reshape(P, 4, N)  # (P, 4, N)

        labels_per_batch = [np.asarray(t["labels"]) for t in targets]
        labels_all = np.concatenate(labels_per_batch)
        boxes_all = np.concatenate([np.asarray(t["boxes"], np.float32) for t in targets], 0)

        per_label_boxes = []
        for label in select_id:
            per_label_boxes.append(boxes_all[labels_all == label])
        T_max = max(max(b.shape[0] for b in per_label_boxes), 1)
        T_pad = _round_up(T_max, 8)

        N_pad = _round_up(N, 128)

        # pack predicted boxes + class-0 logit as one (P, 5, N_pad) slab
        # (dummy valid boxes in the lane padding)
        pred_p = np.empty((P, 5, N_pad), np.float32)
        pred_p[:, 0:2, :] = 0.5
        pred_p[:, 2:4, :] = 0.2
        pred_p[:, 4, :] = 0.0
        pred_p[:, 0:4, :N] = boxes_t
        pred_p[:, 4, :N] = logit0

        # pad target boxes (dummy non-degenerate box) along sublanes
        tbox_p = np.empty((P, T_pad, 4), np.float32)
        tbox_p[:, :, 0:2] = 0.5
        tbox_p[:, :, 2:4] = 0.2
        for i, b in enumerate(per_label_boxes):
            if b.shape[0] > 0:
                tbox_p[i, : b.shape[0], :] = b

        c_all = compute_patch_cost_matrices(
            jnp.asarray(pred_p), jnp.asarray(tbox_p),
            cost_class=self.cost_class, cost_bbox=self.cost_bbox,
            cost_giou=self.cost_giou)
        # slice the real query range on device before the D2H transfer
        c_all = np.asarray(jax.block_until_ready(c_all[:, :, :N]))    # (P, T_pad, N)

        ans = [[[], []] for _ in range(bs)]
        for index, label in enumerate(select_id):
            sizes = [int(np.sum(lb == label)) for lb in labels_per_batch]
            offsets = np.concatenate([[0], np.cumsum(sizes)])
            for b in range(bs):
                s = sizes[b]
                if s == 0:
                    continue
                # rows = this batch's targets of `label`, cols = this batch's queries;
                # transpose back to (queries, targets) for the assignment.
                cb = c_all[index, offsets[b]: offsets[b] + s, b * Q: (b + 1) * Q].T
                x, y = _linear_sum_assignment(cb)
                if len(x) == 0:
                    continue
                x = x + index * Q
                ans[b][0] += x.tolist()
                y_label = np.nonzero(labels_per_batch[b] == label)[0]
                ans[b][1] += y_label[y].tolist()

        return [(np.asarray(i, np.int64), np.asarray(j, np.int64)) for i, j in ans]


# ---------------------------- numpy reference --------------------------------

def _ref_cost_matrices(logit0, boxes, tboxes, wc, wb, wg):
    """logit0: (P,N) class-0 logits; boxes: (P,N,4); tboxes: (P,T,4) -> (P,N,T)."""
    logit0 = np.asarray(logit0); boxes = np.asarray(boxes); tboxes = np.asarray(tboxes)
    P = logit0.shape[0]
    outs = []
    for pi in range(P):
        prob = 1.0 / (1.0 + np.exp(-logit0[pi][:, None]))      # (N,1)
        neg = (1 - ALPHA) * prob ** 2 * -np.log(1 - prob + 1e-8)
        pos = ALPHA * (1 - prob) ** 2 * -np.log(prob + 1e-8)
        cls = pos - neg
        ob = boxes[pi]                                         # (N, 4)
        tb = tboxes[pi]                                        # (T, 4)
        l1 = np.abs(ob[:, None, :] - tb[None, :, :]).sum(-1)
        pxy = np.concatenate([ob[:, :2] - ob[:, 2:] / 2, ob[:, :2] + ob[:, 2:] / 2], -1)
        txy = np.concatenate([tb[:, :2] - tb[:, 2:] / 2, tb[:, :2] + tb[:, 2:] / 2], -1)
        ap = (pxy[:, 2] - pxy[:, 0]) * (pxy[:, 3] - pxy[:, 1])
        at = (txy[:, 2] - txy[:, 0]) * (txy[:, 3] - txy[:, 1])
        lt = np.maximum(pxy[:, None, :2], txy[None, :, :2])
        rb = np.minimum(pxy[:, None, 2:], txy[None, :, 2:])
        wh = np.clip(rb - lt, 0, None)
        inter = wh[..., 0] * wh[..., 1]
        union = ap[:, None] + at[None, :] - inter
        iou = inter / union
        lt2 = np.minimum(pxy[:, None, :2], txy[None, :, :2])
        rb2 = np.maximum(pxy[:, None, 2:], txy[None, :, 2:])
        wh2 = np.clip(rb2 - lt2, 0, None)
        area_c = wh2[..., 0] * wh2[..., 1]
        giou = iou - (area_c - union) / area_c
        outs.append(wb * l1 + wc * cls + wg * (-giou))
    return np.stack(outs, 0)


# --------------------------------- demo ---------------------------------------

if __name__ == "__main__":
    key = jax.random.PRNGKey(0)
    bs, P, Q, C = 2, 2, 8, 4
    select_id = [1, 3]

    k1, k2, k3, k4 = jax.random.split(key, 4)
    pred_logits = jax.random.normal(k1, (bs, P * Q, C), jnp.float32)
    cxcy = jax.random.uniform(k2, (bs, P * Q, 2), jnp.float32, 0.25, 0.75)
    wh = jax.random.uniform(k3, (bs, P * Q, 2), jnp.float32, 0.10, 0.30)
    pred_boxes = jnp.concatenate([cxcy, wh], axis=-1)

    def make_boxes(k, n):
        ka, kb = jax.random.split(k)
        c = jax.random.uniform(ka, (n, 2), jnp.float32, 0.25, 0.75)
        s = jax.random.uniform(kb, (n, 2), jnp.float32, 0.10, 0.30)
        return np.asarray(jnp.concatenate([c, s], -1))

    kt0, kt1 = jax.random.split(k4)
    targets = [
        {"labels": np.array([1, 3, 1], np.int64), "boxes": make_boxes(kt0, 3)},
        {"labels": np.array([3, 1], np.int64), "boxes": make_boxes(kt1, 2)},
    ]

    matcher = OVHungarianMatcherPallas(cost_class=1.0, cost_bbox=1.0, cost_giou=1.0,
                                       cost_embed=0.5)
    outputs = {"pred_logits": pred_logits, "pred_boxes": pred_boxes}
    result = matcher(outputs, targets, select_id, text_embeddings=None)

    # ---- cross-check the Pallas cost-matrix hot path against a numpy reference ----
    N = bs * Q
    pred_logits_np = np.asarray(pred_logits)
    pred_boxes_np = np.asarray(pred_boxes)
    logit0 = np.transpose(pred_logits_np.reshape(bs, P, Q, C)[..., 0], (1, 0, 2)).reshape(P, N)
    boxes_nat = np.transpose(pred_boxes_np.reshape(bs, P, Q, 4), (1, 0, 2, 3)).reshape(P, N, 4)

    labels_all = np.concatenate([t["labels"] for t in targets])
    boxes_all = np.concatenate([t["boxes"] for t in targets], 0)
    T_max = max(int((labels_all == l).sum()) for l in select_id)
    T_pad = _round_up(T_max, 8)
    tbox_p = np.empty((P, T_pad, 4), np.float32)
    tbox_p[:, :, 0:2] = 0.5
    tbox_p[:, :, 2:4] = 0.2
    for i, l in enumerate(select_id):
        b = boxes_all[labels_all == l]
        tbox_p[i, : b.shape[0], :] = b

    N_pad = _round_up(N, 128)
    pred_p = np.empty((P, 5, N_pad), np.float32)
    pred_p[:, 0:2, :] = 0.5
    pred_p[:, 2:4, :] = 0.2
    pred_p[:, 4, :] = 0.0
    pred_p[:, 0:4, :N] = np.transpose(boxes_nat, (0, 2, 1))
    pred_p[:, 4, :N] = logit0

    c_pallas = jax.block_until_ready(
        compute_patch_cost_matrices(jnp.asarray(pred_p), jnp.asarray(tbox_p)))
    c_pallas = np.asarray(c_pallas)[:, :, :N]                         # (P, T_pad, N)
    c_ref = _ref_cost_matrices(logit0, boxes_nat, tbox_p, 1.0, 1.0, 1.0)  # (P, N, T_pad)
    # tolerance loosened vs f32 divide: GIoU uses EUP approx reciprocals in-kernel
    np.testing.assert_allclose(c_pallas, np.transpose(c_ref, (0, 2, 1)),
                               rtol=5e-3, atol=5e-3)

    # sanity on the assignment output format
    for (idx_i, idx_j) in result:
        assert idx_i.dtype == np.int64 and idx_j.dtype == np.int64
        assert len(idx_i) == len(idx_j)

    print("KERNEL_OK")
</pallas_src>

<mosaic_0001>
module attributes {stable_mosaic.version = 11 : i64} {
  func.func @_cost_kernel(%arg0: i32, %arg1: i32, %arg2: memref<1x5x128xf32, #tpu.memory_space<vmem>>, %arg3: memref<1x8x4xf32, #tpu.memory_space<vmem>>, %arg4: memref<1x8x128xf32, #tpu.memory_space<vmem>>) attributes {dimension_semantics = [#tpu.dimension_semantics<parallel>, #tpu.dimension_semantics<parallel>], iteration_bounds = array<i64: 2, 1>, scalar_prefetch = 0 : i64, scratch_operands = 0 : i64, tpu.core_type = #tpu.core_type<tc>, window_params = [{transform_indices = @transform_0, window_bounds = array<i64: 1, 5, 128>}, {transform_indices = @transform_1, window_bounds = array<i64: 1, 8, 4>}, {transform_indices = @transform_2, window_bounds = array<i64: 1, 8, 128>}]} {
    %c0 = arith.constant 0 : index
    %c4 = arith.constant 4 : index
    %c0_0 = arith.constant 0 : index
    %0 = vector.load %arg2[%c0, %c4, %c0_0] : memref<1x5x128xf32, #tpu.memory_space<vmem>>, vector<1x1x128xf32>
    %1 = vector.shape_cast %0 : vector<1x1x128xf32> to vector<1x128xf32>
    %2 = arith.negf %1 : vector<1x128xf32>
    %3 = math.exp %2 : vector<1x128xf32>
    %cst = arith.constant 1.000000e+00 : f32
    %4 = vector.broadcast %cst : f32 to vector<1x128xf32>
    %5 = arith.addf %4, %3 : vector<1x128xf32>
    %6 = arith.divf %4, %5 : vector<1x128xf32>
    %7 = arith.mulf %6, %6 : vector<1x128xf32>
    %cst_1 = arith.constant 7.500000e-01 : f32
    %8 = vector.broadcast %cst_1 : f32 to vector<1x128xf32>
    %9 = arith.mulf %8, %7 : vector<1x128xf32>
    %cst_2 = arith.constant 1.000000e+00 : f32
    %10 = vector.broadcast %cst_2 : f32 to vector<1x128xf32>
    %11 = arith.subf %10, %6 : vector<1x128xf32>
    %cst_3 = arith.constant 9.99999993E-9 : f32
    %12 = vector.broadcast %cst_3 : f32 to vector<1x128xf32>
    %13 = arith.addf %11, %12 : vector<1x128xf32>
    %14 = math.log %13 : vector<1x128xf32>
    %cst_4 = arith.constant 0.000000e+00 : f32
    %15 = vector.broadcast %cst_4 : f32 to vector<1x128xf32>
    %16 = arith.subf %15, %14 : vector<1x128xf32>
    %17 = arith.mulf %9, %16 : vector<1x128xf32>
    %cst_5 = arith.constant 1.000000e+00 : f32
    %18 = vector.broadcast %cst_5 : f32 to vector<1x128xf32>
    %19 = arith.subf %18, %6 : vector<1x128xf32>
    %cst_6 = arith.constant 1.000000e+00 : f32
    %20 = vector.broadcast %cst_6 : f32 to vector<1x128xf32>
    %21 = arith.subf %20, %6 : vector<1x128xf32>
    %22 = arith.mulf %19, %21 : vector<1x128xf32>
    %cst_7 = arith.constant 2.500000e-01 : f32
    %23 = vector.broadcast %cst_7 : f32 to vector<1x128xf32>
    %24 = arith.mulf %23, %22 : vector<1x128xf32>
    %cst_8 = arith.constant 9.99999993E-9 : f32
    %25 = vector.broadcast %cst_8 : f32 to vector<1x128xf32>
    %26 = arith.addf %6, %25 : vector<1x128xf32>
    %27 = math.log %26 : vector<1x128xf32>
    %cst_9 = arith.constant 0.000000e+00 : f32
    %28 = vector.broadcast %cst_9 : f32 to vector<1x128xf32>
    %29 = arith.subf %28, %27 : vector<1x128xf32>
    %30 = arith.mulf %24, %29 : vector<1x128xf32>
    %31 = arith.subf %30, %17 : vector<1x128xf32>
    %cst_10 = arith.constant 1.000000e+00 : f32
    %32 = vector.broadcast %cst_10 : f32 to vector<1x128xf32>
    %33 = arith.mulf %32, %31 : vector<1x128xf32>
    %cst_11 = arith.constant 1.000000e+00 : f32
    %34 = vector.broadcast %cst_11 : f32 to vector<1x128xf32>
    %35 = arith.addf %33, %34 : vector<1x128xf32>
    %c0_12 = arith.constant 0 : index
    %c0_13 = arith.constant 0 : index
    %c0_14 = arith.constant 0 : index
    %36 = vector.load %arg2[%c0_12, %c0_13, %c0_14] : memref<1x5x128xf32, #tpu.memory_space<vmem>>, vector<1x1x128xf32>
    %37 = vector.shape_cast %36 : vector<1x1x128xf32> to vector<1x128xf32>
    %c0_15 = arith.constant 0 : index
    %c1 = arith.constant 1 : index
    %c0_16 = arith.constant 0 : index
    %38 = vector.load %arg2[%c0_15, %c1, %c0_16] : memref<1x5x128xf32, #tpu.memory_space<vmem>>, vector<1x1x128xf32>
    %39 = vector.shape_cast %38 : vector<1x1x128xf32> to vector<1x128xf32>
    %c0_17 = arith.constant 0 : index
    %c2 = arith.constant 2 : index
    %c0_18 = arith.constant 0 : index
    %40 = vector.load %arg2[%c0_17, %c2, %c0_18] : memref<1x5x128xf32, #tpu.memory_space<vmem>>, vector<1x1x128xf32>
    %41 = vector.shape_cast %40 : vector<1x1x128xf32> to vector<1x128xf32>
    %c0_19 = arith.constant 0 : index
    %c3 = arith.constant 3 : index
    %c0_20 = arith.constant 0 : index
    %42 = vector.load %arg2[%c0_19, %c3, %c0_20] : memref<1x5x128xf32, #tpu.memory_space<vmem>>, vector<1x1x128xf32>
    %43 = vector.shape_cast %42 : vector<1x1x128xf32> to vector<1x128xf32>
    %c0_21 = arith.constant 0 : index
    %c0_22 = arith.constant 0 : index
    %c0_23 = arith.constant 0 : index
    %44 = vector.load %arg3[%c0_21, %c0_22, %c0_23] : memref<1x8x4xf32, #tpu.memory_space<vmem>>, vector<1x8x4xf32>
    %45 = vector.shape_cast %44 : vector<1x8x4xf32> to vector<8x4xf32>
    %46 = vector.extract_strided_slice %45 {offsets = [0, 0], sizes = [8, 1], strides = [1, 1]} : vector<8x4xf32> to vector<8x1xf32>
    %47 = vector.extract_strided_slice %45 {offsets = [0, 1], sizes = [8, 1], strides = [1, 1]} : vector<8x4xf32> to vector<8x1xf32>
    %48 = vector.extract_strided_slice %45 {offsets = [0, 2], sizes = [8, 1], strides = [1, 1]} : vector<8x4xf32> to vector<8x1xf32>
    %49 = vector.extract_strided_slice %45 {offsets = [0, 3], sizes = [8, 1], strides = [1, 1]} : vector<8x4xf32> to vector<8x1xf32>
    %cst_24 = arith.constant 1.000000e+00 : f32
    %50 = vector.broadcast %cst_24 : f32 to vector<1x128xf32>
    %51 = arith.mulf %50, %37 : vector<1x128xf32>
    %cst_25 = arith.constant 1.000000e+00 : f32
    %52 = vector.broadcast %cst_25 : f32 to vector<8x1xf32>
    %53 = arith.mulf %52, %46 : vector<8x1xf32>
    %54 = vector.broadcast %51 : vector<1x128xf32> to vector<8x128xf32>
    %55 = vector.broadcast %53 : vector<8x1xf32> to vector<8x128xf32>
    %56 = arith.subf %54, %55 : vector<8x128xf32>
    %57 = math.absf %56 : vector<8x128xf32>
    %cst_26 = arith.constant 1.000000e+00 : f32
    %58 = vector.broadcast %cst_26 : f32 to vector<1x128xf32>
    %59 = arith.mulf %58, %39 : vector<1x128xf32>
    %cst_27 = arith.constant 1.000000e+00 : f32
    %60 = vector.broadcast %cst_27 : f32 to vector<8x1xf32>
    %61 = arith.mulf %60, %47 : vector<8x1xf32>
    %62 = vector.broadcast %59 : vector<1x128xf32> to vector<8x128xf32>
    %63 = vector.broadcast %61 : vector<8x1xf32> to vector<8x128xf32>
    %64 = arith.subf %62, %63 : vector<8x128xf32>
    %65 = math.absf %64 : vector<8x128xf32>
    %66 = arith.addf %57, %65 : vector<8x128xf32>
    %cst_28 = arith.constant 1.000000e+00 : f32
    %67 = vector.broadcast %cst_28 : f32 to vector<1x128xf32>
    %68 = arith.mulf %67, %41 : vector<1x128xf32>
    %cst_29 = arith.constant 1.000000e+00 : f32
    %69 = vector.broadcast %cst_29 : f32 to vector<8x1xf32>
    %70 = arith.mulf %69, %48 : vector<8x1xf32>
    %71 = vector.broadcast %68 : vector<1x128xf32> to vector<8x128xf32>
    %72 = vector.broadcast %70 : vector<8x1xf32> to vector<8x128xf32>
    %73 = arith.subf %71, %72 : vector<8x128xf32>
    %74 = math.absf %73 : vector<8x128xf32>
    %75 = arith.addf %66, %74 : vector<8x128xf32>
    %cst_30 = arith.constant 1.000000e+00 : f32
    %76 = vector.broadcast %cst_30 : f32 to vector<1x128xf32>
    %77 = arith.mulf %76, %43 : vector<1x128xf32>
    %cst_31 = arith.constant 1.000000e+00 : f32
    %78 = vector.broadcast %cst_31 : f32 to vector<8x1xf32>
    %79 = arith.mulf %78, %49 : vector<8x1xf32>
    %80 = vector.broadcast %77 : vector<1x128xf32> to vector<8x128xf32>
    %81 = vector.broadcast %79 : vector<8x1xf32> to vector<8x128xf32>
    %82 = arith.subf %80, %81 : vector<8x128xf32>
    %83 = math.absf %82 : vector<8x128xf32>
    %84 = arith.addf %75, %83 : vector<8x128xf32>
    %cst_32 = arith.constant 5.000000e-01 : f32
    %85 = vector.broadcast %cst_32 : f32 to vector<1x128xf32>
    %86 = arith.mulf %85, %41 : vector<1x128xf32>
    %cst_33 = arith.constant 5.000000e-01 : f32
    %87 = vector.broadcast %cst_33 : f32 to vector<1x128xf32>
    %88 = arith.mulf %87, %43 : vector<1x128xf32>
    %cst_34 = arith.constant 5.000000e-01 : f32
    %89 = vector.broadcast %cst_34 : f32 to vector<8x1xf32>
    %90 = arith.mulf %89, %48 : vector<8x1xf32>
    %cst_35 = arith.constant 5.000000e-01 : f32
    %91 = vector.broadcast %cst_35 : f32 to vector<8x1xf32>
    %92 = arith.mulf %91, %49 : vector<8x1xf32>
    %93 = arith.subf %37, %86 : vector<1x128xf32>
    %94 = arith.addf %37, %86 : vector<1x128xf32>
    %95 = arith.subf %39, %88 : vector<1x128xf32>
    %96 = arith.addf %39, %88 : vector<1x128xf32>
    %97 = arith.subf %46, %90 : vector<8x1xf32>
    %98 = arith.addf %46, %90 : vector<8x1xf32>
    %99 = arith.subf %47, %92 : vector<8x1xf32>
    %100 = arith.addf %47, %92 : vector<8x1xf32>
    %101 = arith.mulf %41, %43 : vector<1x128xf32>
    %102 = arith.mulf %48, %49 : vector<8x1xf32>
    %103 = vector.broadcast %94 : vector<1x128xf32> to vector<8x128xf32>
    %104 = vector.broadcast %98 : vector<8x1xf32> to vector<8x128xf32>
    %105 = arith.minimumf %103, %104 : vector<8x128xf32>
    %106 = vector.broadcast %93 : vector<1x128xf32> to vector<8x128xf32>
    %107 = vector.broadcast %97 : vector<8x1xf32> to vector<8x128xf32>
    %108 = arith.maximumf %106, %107 : vector<8x128xf32>
    %109 = arith.subf %105, %108 : vector<8x128xf32>
    %cst_36 = arith.constant 0.000000e+00 : f32
    %110 = vector.broadcast %cst_36 : f32 to vector<8x128xf32>
    %111 = arith.maximumf %109, %110 : vector<8x128xf32>
    %112 = vector.broadcast %96 : vector<1x128xf32> to vector<8x128xf32>
    %113 = vector.broadcast %100 : vector<8x1xf32> to vector<8x128xf32>
    %114 = arith.minimumf %112, %113 : vector<8x128xf32>
    %115 = vector.broadcast %95 : vector<1x128xf32> to vector<8x128xf32>
    %116 = vector.broadcast %99 : vector<8x1xf32> to vector<8x128xf32>
    %117 = arith.maximumf %115, %116 : vector<8x128xf32>
    %118 = arith.subf %114, %117 : vector<8x128xf32>
    %cst_37 = arith.constant 0.000000e+00 : f32
    %119 = vector.broadcast %cst_37 : f32 to vector<8x128xf32>
    %120 = arith.maximumf %118, %119 : vector<8x128xf32>
    %121 = arith.mulf %111, %120 : vector<8x128xf32>
    %122 = vector.broadcast %101 : vector<1x128xf32> to vector<8x128xf32>
    %123 = vector.broadcast %102 : vector<8x1xf32> to vector<8x128xf32>
    %124 = arith.addf %122, %123 : vector<8x128xf32>
    %125 = arith.subf %124, %121 : vector<8x128xf32>
    %cst_38 = arith.constant 9.99999996E-13 : f32
    %126 = vector.broadcast %cst_38 : f32 to vector<8x128xf32>
    %127 = arith.maximumf %125, %126 : vector<8x128xf32>
    %128 = vector.broadcast %94 : vector<1x128xf32> to vector<8x128xf32>
    %129 = vector.broadcast %98 : vector<8x1xf32> to vector<8x128xf32>
    %130 = arith.maximumf %128, %129 : vector<8x128xf32>
    %131 = vector.broadcast %93 : vector<1x128xf32> to vector<8x128xf32>
    %132 = vector.broadcast %97 : vector<8x1xf32> to vector<8x128xf32>
    %133 = arith.minimumf %131, %132 : vector<8x128xf32>
    %134 = arith.subf %130, %133 : vector<8x128xf32>
    %135 = vector.broadcast %96 : vector<1x128xf32> to vector<8x128xf32>
    %136 = vector.broadcast %100 : vector<8x1xf32> to vector<8x128xf32>
    %137 = arith.maximumf %135, %136 : vector<8x128xf32>
    %138 = vector.broadcast %95 : vector<1x128xf32> to vector<8x128xf32>
    %139 = vector.broadcast %99 : vector<8x1xf32> to vector<8x128xf32>
    %140 = arith.minimumf %138, %139 : vector<8x128xf32>
    %141 = arith.subf %137, %140 : vector<8x128xf32>
    %142 = arith.mulf %134, %141 : vector<8x128xf32>
    %cst_39 = arith.constant 9.99999996E-13 : f32
    %143 = vector.broadcast %cst_39 : f32 to vector<8x128xf32>
    %144 = arith.maximumf %142, %143 : vector<8x128xf32>
    %145 = tpu.reciprocal %127 {approx = true} : vector<8x128xf32> -> vector<8x128xf32>
    %146 = tpu.reciprocal %144 {approx = true} : vector<8x128xf32> -> vector<8x128xf32>
    %147 = arith.mulf %121, %145 : vector<8x128xf32>
    %148 = arith.mulf %127, %146 : vector<8x128xf32>
    %149 = arith.addf %147, %148 : vector<8x128xf32>
    %150 = vector.broadcast %35 : vector<1x128xf32> to vector<8x128xf32>
    %151 = arith.addf %84, %150 : vector<8x128xf32>
    %cst_40 = arith.constant 1.000000e+00 : f32
    %152 = vector.broadcast %cst_40 : f32 to vector<8x128xf32>
    %153 = arith.mulf %152, %149 : vector<8x128xf32>
    %154 = arith.subf %151, %153 : vector<8x128xf32>
    %c0_41 = arith.constant 0 : index
    %c0_42 = arith.constant 0 : index
    %c0_43 = arith.constant 0 : index
    %155 = vector.load %arg4[%c0_41, %c0_42, %c0_43] : memref<1x8x128xf32, #tpu.memory_space<vmem>>, vector<1x8x128xf32>
    %156 = vector.shape_cast %155 : vector<1x8x128xf32> to vector<8x128xf32>
    %157 = vector.shape_cast %154 : vector<8x128xf32> to vector<1x8x128xf32>
    tpu.vector_store %arg4[%c0_41, %c0_42, %c0_43], %157 {strides = array<i32>} : memref<1x8x128xf32, #tpu.memory_space<vmem>>, vector<1x8x128xf32>,
    return
  }
  func.func @transform_0(%arg0: i32, %arg1: i32) -> (i32, i32, i32) {
    %c0_i32 = arith.constant 0 : i32
    %c0_i32_0 = arith.constant 0 : i32
    return %arg0, %c0_i32, %arg1 : i32, i32, i32
  }
  func.func @transform_1(%arg0: i32, %arg1: i32) -> (i32, i32, i32) {
    %c0_i32 = arith.constant 0 : i32
    %c0_i32_0 = arith.constant 0 : i32
    %c0_i32_1 = arith.constant 0 : i32
    return %arg0, %c0_i32, %c0_i32_0 : i32, i32, i32
  }
  func.func @transform_2(%arg0: i32, %arg1: i32) -> (i32, i32, i32) {
    %c0_i32 = arith.constant 0 : i32
    %c0_i32_0 = arith.constant 0 : i32
    return %arg0, %c0_i32, %arg1 : i32, i32, i32
  }
}

</mosaic_0001>

<bundles_post_ra>
// kernel: tpu_custom_call.1
= control target key start
LH: loop header
LB: loop body
LE: loop exit
PB: predicated region body
PF: predicated region fallthrough
CT: control target
= control target key end

     0   :  { %7 = vsyncpa [#allocation3], 0  ;;  %s786_s0 = inlined_call_operand.vmem [shape: f32[2,5,128], index: 0, kind: input, shape index: {}]   ;;  %s787_s1 = inlined_call_operand.vmem [shape: f32[2,8,4], index: 1, kind: input, shape index: {}]   ;;  %s788_s2 = inlined_call_operand.hbm [shape: f32[2,8,128], index: 2, kind: output, shape index: {}]  }
   0x1   :  { %9 = vsyncpa [#allocation3 + $0x1], 0  ;;  %s642_s9 = smov 0   ;;  %s644_s10 = smov 0  }
   0x2   :  { %s646_s11 = smov 0   ;;  %s648_s12 = smov 0  }
   0x3   :  { %s650_s13 = smov 0   ;;  %s652_s14 = smov 0  }
   0x4 LB: > { %s445_s15 = sadd.s32 4294967295, %s618_s14   ;;  %s446_s16 = sadd.s32 4294967294, %s618_s14   ;;  %s618_s14 = sphi %s652_s14, %s15_s14   ;;  %s614_s13 = sphi %s650_s13, %s795_s13   ;;  %s610_s12 = sphi %s648_s12, %s794_s12   ;;  %s606_s11 = sphi %s646_s11, %s793_s11   ;;  %s602_s10 = sphi %s644_s10, %s792_s10   ;;  %s598_s9 = sphi %s642_s9, %s791_s9  }
   0x5   : > { %s27_s17 = sadd.s32 1, %s614_s13  ;;  %s90_s18 = sadd.s32 1, %s606_s11 }
   0x6   : > { %p29_p0 = scmp.ge.s32.totalorder %s27_s17, 2  ;;  %p100_p1 = scmp.ne.s32.totalorder %s606_s11, %s602_s10 }
   0x7   : > { %p101_p2 = scmp.eq.s32.totalorder %s445_s15, 1  ;;  %p106_p3 = scmp.ne.s32.totalorder %s602_s10, %s598_s9 }
   0x8   : > { %s797_s17 = smov (%p29_p0, %s27_s17), 0  ;;  %p107_p5 = scmp.eq.s32.totalorder %s446_s16, 1 }
   0x9   : > { %p682_p4 = por %p101_p2, %p100_p1  ;;  %s85_s20 = ssub.s32 %s614_s13, %s797_s17 }
   0xa   : > { %p449_p6 = scmp.ge.s32.totalorder %s618_s14, 1  ;;  %p88_p7 = scmp.eq.s32.totalorder %s85_s20, 0 }
   0xb   : > { %p689_p8 = por %p107_p5, %p106_p3  ;;  %p142_p9 = scmp.lt.s32.totalorder %s618_s14, 3 }
   0xc   : > { %s695_s22 = scalar_select %p88_p7, %s606_s11, %s90_s18  }
   0xd   : > { %p143_p10 = pnand %p449_p6, %p142_p9 }
   0xe   : > { %p170_p11 = scmp.lt.s32.totalorder (!%p143_p10), %s610_s12, 1  ;;  %v620_v0 = vmov (!%p143_p10), 1   ;;  %v621_v1 = vmov (!%p143_p10), 0   ;;  %s622_s28 = smov (!%p143_p10), 126   ;;  %v624_v8 = vmov (!%p143_p10), 3   ;;  %v625_v10 = vmov (!%p143_p10), 2  }
   0xf   : > { %146 = sbr.rel (%p143_p10) target bundleno = 326 (0x146), region = 28  ;;  %520 = vset.pattern.permute.xlu0 (!%p143_p10), %v620_v0  ;;  %519 = vset.pattern.permute.xlu1 (!%p143_p10), %v621_v1  ;;  %s623_s29 = smov (!%p143_p10), 127   ;;  %v210_v17 = vlaneseq (!%p143_p10) }
  0x10   : > { %s167_s5 = sand.u32 (!%p143_p10), 1, %s602_s10   ;;  %s455_s7 = sshll.u32 (!%p143_p10), %s610_s12, 7 }
  0x11   : > { %v211_v22 = vshrl.u32 (!%p143_p10), %v210_v17, 7  ;;  %s450_s6 = sshll.u32 (!%p143_p10), %s167_s5, 3  ;;  %s739_s20 = scalar_lea.hbm (!%p143_p10), %s788_s2, %s455_s7 }
  0x12   : > { %s169_s8 = scalar_lea.vmem (!%p143_p10), [#allocation2], %s450_s6 }
  0x13   : > { %v718_v28 = vsub.s32 (!%p143_p10), 0, %v211_v22  ;;  %s362_s15 = sshll.u32 (!%p143_p10), %s169_s8, 4  ;;  %s741_s15 = int_to_ptr.vmem [resolvable:$true] %s362_s15 }
  0x16   : > { %s699_s23 = scalar_select %p170_p11, %s610_s12, 1 }
  0x17   : > { %s626_s12 = smov [#allocation2]  }
  0x18   : > { %s451_s24 = sshll.u32 %s699_s23, 3  ;;  %s348_s23 = scalar_lea.sflag [#allocation3], %s167_s5 }
  0x19   : > { %s180_s27 = scalar_lea.vmem %s787_s1, %s451_s24  ;;  %s176_s4 = scalar_lea.vmem %s786_s0, %s451_s24 }
  0x1a   : > { %v209_v2 = vld [vmem:[%s180_s27] sm:$0xff]  ;;  %s540_s24 = scalar_lea.vmem %s741_s15, 128  ;;  %s544_s25 = sshll.u32 %s626_s12, 4  ;;  %s545_s25 = int_to_ptr.vmem [resolvable:$false] %s544_s25 }
  0x1b   : > { %v256_v3 = vmul.f32 0.5, %v209_v2  ;;  %v181_v11 = vld [vmem:[%s176_s4 + $0x4] sm:$0x1]  ;;  %v712_v18 = vld [vmem:[%s176_s4 + $0x2] sm:$0x1]  ;;  %p541_p12 = scmp.ne.s32.totalorder %s741_s15, %s540_s24  ;;  %s546_s26 = scalar_lea.vmem %s545_s25, 256 }
  0x1c   : > { %v453_v12 = vmul.f32 -1.442695, %v181_v11  ;;  %v714_v20 = vld [vmem:[%s176_s4 + $0x3] sm:$0x1]  ;;  %v254_v23 = vmul.f32 0.5, %v712_v18  ;;  %v235_v22 = vrot.slane %v712_v18, %v718_v28  ;;  %p547_p1 = scmp.lt.s32.totalorder %s741_s15, %s545_s25  ;;  %p548_p2 = scmp.lt.s32.totalorder %s546_s26, %s540_s24 }
  0x1d   : > { %262 = vrot.lane.b32.xlu0 %v256_v3, %s622_s28  ;;  %v205_v24 = vld [vmem:[%s176_s4] sm:$0x1]  ;;  %v255_v25 = vmul.f32 0.5, %v714_v20  ;;  %v206_v26 = vld [vmem:[%s176_s4 + $0x1] sm:$0x1]  ;;  %v267_v41 = vmul.f32 %v714_v20, %v712_v18  ;;  %p542_p13 = pnand %p541_p12, %p682_p4 }
  0x1e   : > { %528 = vpow2.f32 %v453_v12  ;;  %v257_v27 = vsub.f32 %v205_v24, %v254_v23  ;;  %v258_v30 = vadd.f32 %v254_v23, %v205_v24  ;;  %v213_v60 = vrot.slane %v205_v24, %v718_v28  ;;  %p549_p3 = por %p548_p2, %p547_p1 }
  0x1f   : > { %v260_v31 = vadd.f32 %v255_v25, %v206_v26  ;;  %v259_v33 = vsub.f32 %v206_v26, %v255_v25  ;;  %v318_v53 = vrot.slane %v267_v41, %v718_v28  ;;  %p543_p0 = pneg %p542_p13 }
  0x20   : > { %v285_v32 = vrot.slane %v257_v27, %v718_v28  ;;  %v275_v34 = vrot.slane %v258_v30, %v718_v28 }
  0x21   : > { %268 = vrot.lane.b32.xlu0 %v209_v2, %s623_s29  ;;  %v297_v36 = vrot.slane %v260_v31, %v718_v28  ;;  %v306_v39 = vrot.slane %v259_v33, %v718_v28  ;;  %p550_p5 = pnand %p549_p3, %p543_p0 }
  0x28   : > { %v529_v13 = vpop.eup %528 }
  0x29   : > { %v185_v14 = vadd.f32 1.0, %v529_v13 }
  0x2b   : > { %530 = vrcp.f32 %v185_v14 }
  0x35   : > { %v531_v15 = vpop.eup %530 }
  0x36   : > { %v190_v16 = vsub.f32 1.0, %v531_v15  ;;  %v198_v21 = vadd.f32 1e-08, %v531_v15  ;;  %v188_v48 = vmul.f32 %v531_v15, %v531_v15  ;;  %v246_v15 = vrot.slane %v714_v20, %v718_v28 }
  0x38   : > { %v191_v19 = vadd.f32 1e-08, %v190_v16  ;;  %v196_v55 = vmul.f32 %v190_v16, %v190_v16 }
  0x3a   : > { %532 = vlog2.f32 %v191_v19 }
  0x3b   : > { %534 = vlog2.f32 %v198_v21 }
  0x44   : > { %v533_v40 = vpop.eup %532 }
  0x45   : > { %v535_v42 = vpop.eup %534  ;;  %v193_v54 = vmul.f32 0.6931472, %v533_v40 }
  0x46   : > { %v200_v56 = vmul.f32 0.6931472, %v535_v42 }
  0x8f   : > { %v263_v4 = vpop.permute.xlu0 %262 }
  0x90   : > { %v266_v5 = vadd.f32 %v263_v4, %v209_v2  ;;  %v265_v6 = vsub.f32 %v209_v2, %v263_v4  ;;  %v194_v4 = vsub.f32 0.0, %v193_v54 }
  0x92   : > { %299 = vperm.xlu0 %520, %v266_v5   ;;  %278 = vperm.xlu1 %519, %v266_v5   ;;  %v197_v5 = vmul.f32 0.25, %v196_v55 }
  0x93   : > { %v269_v7 = vpop.permute.xlu0 %268 }
  0x94   : > { %v271_v9 = vmul.f32 %v269_v7, %v209_v2 }
  0x96   : > { %288 = vperm.xlu1 %519, %v265_v6   ;;  %523 = vset.pattern.permute.xlu0 %v621_v1 }
  0x97   : > { %216 = vperm.xlu0 %523, %v209_v2  }
  0x9a   : > { %521 = vset.pattern.permute.xlu1 %v620_v0 }
  0x9b   : > { %308 = vperm.xlu1 %521, %v265_v6   ;;  %526 = vset.pattern.permute.xlu0 %v624_v8  ;;  %v201_v6 = vsub.f32 0.0, %v200_v56 }
  0x9c   : > { %248 = vperm.xlu0 %526, %v209_v2  }
  0x9d   : > { %v202_v14 = vmul.f32 %v201_v6, %v197_v5 }
  0x9f   : > { %522 = vset.pattern.permute.xlu1 %v625_v10 }
  0xa0   : > { %321 = vperm.xlu1 %522, %v271_v9   ;;  %527 = vset.pattern.permute.xlu0 %v625_v10  ;;  %v224_v9 = vrot.slane %v206_v26, %v718_v28 }
  0xa4   : > { %524 = vset.pattern.permute.xlu1 %v620_v0 }
  0xa5   : > { %226 = vperm.xlu1 %524, %v209_v2  }
  0xa9   : > { %525 = vset.pattern.permute.xlu1 %v625_v10 }
  0xaa   : > { %237 = vperm.xlu1 %525, %v209_v2   ;;  %v189_v2 = vmul.f32 0.75, %v188_v48 }
  0xac   : > { %v195_v13 = vmul.f32 %v194_v4, %v189_v2 }
  0xae   : > { %v203_v24 = vsub.f32 %v202_v14, %v195_v13 }
  0xb0   : > { %v204_v31 = vadd.f32 1.0, %v203_v24 }
 0x111   : > { %v279_v29 = vpop.permute.xlu1 %278  ;;  %v300_v37 = vpop.permute.xlu0 %299 }
 0x112   : > { %v281_v43 = vmin.f32 %v275_v34, %v279_v29  ;;  %v327_v45 = vmax.f32 %v275_v34, %v279_v29  ;;  %v302_v46 = vmin.f32 %v297_v36, %v300_v37  ;;  %v330_v49 = vmax.f32 %v297_v36, %v300_v37 }
 0x115   : > { %v289_v35 = vpop.permute.xlu1 %288 }
 0x116   : > { %v291_v38 = vmax.f32 %v285_v32, %v289_v35  ;;  %v328_v44 = vmin.f32 %v285_v32, %v289_v35  ;;  %v217_v1 = vpop.permute.xlu0 %216  ;;  %v343_v35 = vrot.slane %v204_v31, %v718_v28 }
 0x117   : > { %v219_v10 = vsub.f32 %v213_v60, %v217_v1 }
 0x118   : > { %v292_v50 = vsub.f32 %v281_v43, %v291_v38  ;;  %v329_v57 = vsub.f32 %v327_v45, %v328_v44 }
 0x119   : > { %v220_v21 = vand.u32 2147483647, %v219_v10 }
 0x11a   : > { %v309_v47 = vpop.permute.xlu1 %308  ;;  %v293_v61 = vmax.f32 %v292_v50, 0.0 }
 0x11b   : > { %v311_v51 = vmax.f32 %v306_v39, %v309_v47  ;;  %v331_v52 = vmin.f32 %v306_v39, %v309_v47  ;;  %v249_v19 = vpop.permute.xlu0 %248 }
 0x11c   : > { %v251_v25 = vsub.f32 %v246_v15, %v249_v19 }
 0x11d   : > { %v312_v58 = vsub.f32 %v302_v46, %v311_v51  ;;  %v332_v59 = vsub.f32 %v330_v49, %v331_v52 }
 0x11e   : > { %v252_v20 = vand.u32 2147483647, %v251_v25 }
 0x11f   : > { %v313_v62 = vmax.f32 %v312_v58, 0.0  ;;  %v333_v63 = vmul.f32 %v332_v59, %v329_v57  ;;  %v322_v0 = vpop.permute.xlu1 %321 }
 0x120   : > { %v324_v3 = vadd.f32 %v322_v0, %v318_v53 }
 0x121   : > { %v334_v7 = vmax.f32 %v333_v63, 1e-12  ;;  %v314_v8 = vmul.f32 %v313_v62, %v293_v61 }
 0x123   : > { %v325_v11 = vsub.f32 %v324_v3, %v314_v8  ;;  %536 = vrcp.f32 %v334_v7 }
 0x124   : > { %v227_v12 = vpop.permute.xlu1 %226 }
 0x125   : > { %v326_v16 = vmax.f32 %v325_v11, 1e-12  ;;  %v229_v17 = vsub.f32 %v224_v9, %v227_v12 }
 0x127   : > { %538 = vrcp.f32 %v326_v16  ;;  %v230_v23 = vand.u32 2147483647, %v229_v17 }
 0x129   : > { %v238_v26 = vpop.permute.xlu1 %237  ;;  %v231_v27 = vadd.f32 %v230_v23, %v220_v21 }
 0x12a   : > { %v240_v29 = vsub.f32 %v235_v22, %v238_v26 }
 0x12c   : > { %v241_v30 = vand.u32 2147483647, %v240_v29 }
 0x12d   : > { %v537_v33 = vpop.eup %536 }
 0x12e   : > { %v242_v32 = vadd.f32 %v241_v30, %v231_v27  ;;  %v338_v37 = vmul.f32 %v537_v33, %v326_v16 }
 0x130   : > { %v253_v34 = vadd.f32 %v252_v20, %v242_v32 }
 0x131   : > { %v539_v18 = vpop.eup %538 }
 0x132   : > { %v337_v36 = vmul.f32 %v539_v18, %v314_v8  ;;  %v344_v39 = vadd.f32 %v343_v35, %v253_v34 }
 0x134   : > { %v339_v38 = vadd.f32 %v338_v37, %v337_v36 }
 0x136   : > { %v345_v40 = vsub.f32 %v344_v39, %v339_v38 }
 0x138   : > { %346 = vst [vmem:[%s169_s8] sm:$0xff] %v345_v40 }
 0x139   : > { %553 = shalt.err (!%p550_p5)
}
 0x13a   : > { %s554_s27 = scalar_lea.hbm %s739_s20, 128  ;;  %s558_s30 = scalar_lea.hbm %s788_s2, 256 }
 0x13b   : > { %p555_p6 = scmp.ne.s32.totalorder %s739_s20, %s554_s27  ;;  %p559_p10 = scmp.lt.u32.totalorder %s739_s20, %s788_s2 }
 0x13c   : > { %p560_p11 = scmp.lt.u32.totalorder %s558_s30, %s554_s27  ;;  %p562_p13 = scmp.lt.u32.totalorder %s554_s27, %s739_s20 }
 0x13d   : > { %p556_p7 = pnand %p555_p6, %p682_p4 }
 0x13e   : > { %p561_p12 = por %p560_p11, %p559_p10 }
 0x13f   : > { %p557_p9 = pneg %p556_p7 }
 0x140   : > { %p563_p0 = por %p562_p13, %p561_p12 }
 0x142   : > { %p564_p1 = pnand %p563_p0, %p557_p9 }
 0x144   : > { %567 = shalt.err (!%p564_p1)
}
 0x145   : > { %458 = dma.vmem_to_hbm [thread:$0]  (%p682_p4), %s741_s15, 128, %s739_s20, %s348_s23  }
 0x146 PF: > { %p464_p2 = scmp.ge.s32.totalorder %s618_s14, 2  ;;  %s374_s5 = sand.u32 1, %s598_s9  }
 0x147   : > { %s375_s6 = scalar_lea.sflag [#allocation3], %s374_s5 }
 0x148   : > { %p461_p3 = pnand %p464_p2, %p689_p8 }
 0x14a   : > { %593 = dma.done.wait (!%p461_p3), %s375_s6, 128  }
 0x14b   : > { %595 = vsyncadd (!%p461_p3), %s375_s6, 4294967168  ;;  %s15_s14 = sadd.s32 1, %s618_s14   ;;  %s791_s9 = smov %s602_s10 }
 0x14c   : > { %p12_p5 = scmp.ge.s32.totalorder %s15_s14, 4   ;;  %s792_s10 = smov %s606_s11 }
 0x14d   : > { %s793_s11 = smov %s695_s22  ;;  %s794_s12 = smov %s614_s13 }
 0x14e   : > { %s795_s13 = smov %s797_s17  ;;  %14 = sbr.rel (!%p12_p5) target bundleno = 4 (0x4), region = 66 }
 0x155   :  { %380 = vsyncpa [#allocation3], 1 }
 0x156   :  { %382 = vsyncpa [#allocation3 + $0x1], 1 }

</bundles_post_ra>
